<compile_context>
chip_gen: v7x
topology: tpu7x:2x2x1
jax: 0.10.0
libtpu: 0.0.40
codegen_flags: <defaults>
</compile_context>

<pallas_src>
import math

import jax
import jax.numpy as jnp
from jax.experimental import pallas as pl
from jax.experimental.pallas import tpu as pltpu


def _round_up(x, m):
    return (x + m - 1) // m * m


def _row_tile(r, pref):
    """Pick (row_tile, padded_rows) for an [r, C] operand.

    Large r: largest tile from {pref, pref/2, pref/4, pref/8} whose padding
    waste stays <= 12.5% (amortizes the ~0.35us/grid-step overhead without
    blowing up padded work on awkward row counts).
    Mid-sized r (single-tile regime): split into 2 tiles so both v7x
    TensorCores get a "parallel" tile.
    """
    rp = _round_up(r, 8)
    if rp <= pref:
        if rp >= 512:
            rp = _round_up(r, 16)
            return rp // 2, rp          # 2 parallel tiles (megacore)
        return rp, rp
    for t in (pref, pref // 2, pref // 4, pref // 8):
        rpt = _round_up(rp, t)
        if (rpt - rp) * 8 <= rp:        # <=12.5% padding waste
            return t, rpt
    return pref // 8, _round_up(rp, pref // 8)


def _vmem_limit(*block_bytes):
    """Scoped-VMEM budget: double-buffered pipeline blocks + headroom, clamped
    so a v7x part (64 MiB physical VMEM, 2 TensorCores) is never
    over-subscribed."""
    need = 2 * sum(int(b) for b in block_bytes) + (8 << 20)
    return int(min(max(need, 16 << 20), 40 << 20))


# --------------------------------------------------------------------------
# Pallas kernel 1: fused Linear (BN folded into W) + bias + ReLU
# --------------------------------------------------------------------------
def _linear_relu_kernel(x_ref, w_ref, b_ref, o_ref):
    y = jnp.dot(x_ref[...], w_ref[...], preferred_element_type=jnp.float32)
    o_ref[...] = jnp.maximum(y + b_ref[...], 0.0).astype(o_ref.dtype)


def linear_relu(x, w, b, *, pref_tile=4096, compute_dtype=jnp.float32,
                out_dtype=jnp.float32):
    """relu(x @ w + b).  x: [R, Cin], w: [Cin, Cout] (BN-folded), b: [1, Cout] f32."""
    R, Cin = x.shape
    Cout = w.shape[1]
    tr, rp = _row_tile(R, pref_tile)
    if rp != R:
        x = jnp.pad(x, ((0, rp - R), (0, 0)))
    x = x.astype(compute_dtype)
    w = w.astype(compute_dtype)
    isz = jnp.dtype(compute_dtype).itemsize
    vmem = _vmem_limit(tr * Cin * isz, Cin * Cout * isz, tr * Cout * 4)
    out = pl.pallas_call(
        _linear_relu_kernel,
        out_shape=jax.ShapeDtypeStruct((rp, Cout), out_dtype),
        grid_spec=pltpu.PrefetchScalarGridSpec(
            num_scalar_prefetch=0,
            grid=(rp // tr,),
            in_specs=[
                pl.BlockSpec((tr, Cin), lambda i: (i, 0)),
                pl.BlockSpec((Cin, Cout), lambda i: (0, 0)),
                pl.BlockSpec((1, Cout), lambda i: (0, 0)),
            ],
            out_specs=pl.BlockSpec((tr, Cout), lambda i: (i, 0)),
        ),
        compiler_params=pltpu.CompilerParams(
            dimension_semantics=("parallel",), vmem_limit_bytes=vmem),
    )(x, w, b)
    return out[:R] if rp != R else out


# --------------------------------------------------------------------------
# Pallas kernel 2: fused dual-input Linear + bias + ReLU
#   relu(x1 @ w1 + x2 @ w2 + b)  ==  relu(concat([x1, x2], 1) @ [w1; w2] + b)
# --------------------------------------------------------------------------
def _dual_linear_relu_kernel(x1_ref, x2_ref, w1_ref, w2_ref, b_ref, o_ref):
    y = jnp.dot(x1_ref[...], w1_ref[...], preferred_element_type=jnp.float32)
    y = y + jnp.dot(x2_ref[...], w2_ref[...], preferred_element_type=jnp.float32)
    o_ref[...] = jnp.maximum(y + b_ref[...], 0.0).astype(o_ref.dtype)


def dual_linear_relu(x1, x2, w1, w2, b, *, pref_tile=4096,
                     compute_dtype=jnp.float32, out_dtype=jnp.float32):
    R, C1 = x1.shape
    C2 = x2.shape[1]
    Cout = w1.shape[1]
    tr, rp = _row_tile(R, pref_tile)
    if rp != R:
        x1 = jnp.pad(x1, ((0, rp - R), (0, 0)))
        x2 = jnp.pad(x2, ((0, rp - R), (0, 0)))
    x1 = x1.astype(compute_dtype)
    x2 = x2.astype(compute_dtype)
    w1 = w1.astype(compute_dtype)
    w2 = w2.astype(compute_dtype)
    isz = jnp.dtype(compute_dtype).itemsize
    vmem = _vmem_limit(tr * C1 * isz, tr * C2 * isz,
                       (C1 + C2) * Cout * isz, tr * Cout * 4)
    out = pl.pallas_call(
        _dual_linear_relu_kernel,
        out_shape=jax.ShapeDtypeStruct((rp, Cout), out_dtype),
        grid_spec=pltpu.PrefetchScalarGridSpec(
            num_scalar_prefetch=0,
            grid=(rp // tr,),
            in_specs=[
                pl.BlockSpec((tr, C1), lambda i: (i, 0)),
                pl.BlockSpec((tr, C2), lambda i: (i, 0)),
                pl.BlockSpec((C1, Cout), lambda i: (0, 0)),
                pl.BlockSpec((C2, Cout), lambda i: (0, 0)),
                pl.BlockSpec((1, Cout), lambda i: (0, 0)),
            ],
            out_specs=pl.BlockSpec((tr, Cout), lambda i: (i, 0)),
        ),
        compiler_params=pltpu.CompilerParams(
            dimension_semantics=("parallel",), vmem_limit_bytes=vmem),
    )(x1, x2, w1, w2, b)
    return out[:R] if rp != R else out


# --------------------------------------------------------------------------
# Pallas kernel 3: scatter_to — per-voxel max / mean reduction over points
#   grid = (V/tv, N/tn); points axis last, "arbitrary" (output-resident acc).
# --------------------------------------------------------------------------
def _scatter_max_kernel(idx_ref, cnt_ref, pf_ref, o_ref):
    # idx_ref: (Np,) int32 in SMEM (scalar prefetch); cnt_ref: (tv, 1) int32
    # pf_ref: (tn, C); o_ref: (tv, C) f32 (accumulator across the N axis)
    n_step = pl.program_id(1)
    n_last = pl.num_programs(1) - 1
    tv = o_ref.shape[0]
    tn = pf_ref.shape[0]
    v0 = pl.program_id(0) * tv
    n_base = n_step * tn

    @pl.when(n_step == 0)
    def _():
        o_ref[...] = jnp.full_like(o_ref, -jnp.inf)

    vids = v0 + jax.lax.broadcasted_iota(jnp.int32, (tv, 1), 0)

    def body(n, acc):
        vid = idx_ref[n_base + n]                 # scalar SMEM read
        row = pf_ref[pl.ds(n, 1), :]              # (1, C)
        cand = jnp.where(vids == vid, row, -jnp.inf)   # (tv, C), vreg-resident
        return jnp.maximum(acc, cand)

    acc = jax.lax.fori_loop(0, tn, body, o_ref[...], unroll=8)

    is_last = n_step == n_last
    cnt = cnt_ref[...]
    # non-last steps: keep accumulating; last step: empty voxels -> 0
    o_ref[...] = jnp.where(jnp.logical_and(is_last, cnt <= 0), 0.0, acc)


def _scatter_mean_kernel(idx_ref, cnt_ref, pf_ref, o_ref):
    # idx_ref: (1, tn) int32; cnt_ref: (tv, 1) int32; pf_ref: (tn, C); o_ref: (tv, C)
    n_step = pl.program_id(1)
    tv = o_ref.shape[0]
    tn = pf_ref.shape[0]
    v0 = pl.program_id(0) * tv

    @pl.when(n_step == 0)
    def _():
        o_ref[...] = jnp.zeros_like(o_ref)

    vids = v0 + jax.lax.broadcasted_iota(jnp.int32, (tv, 1), 0)
    # Build the one-hot mask in <=256-point chunks so the (tv, chunk)
    # intermediate stays small even with tv=512 / tn=1024; mask is built in the
    # point-feature dtype (bf16 when enabled -> native bf16 MXU rate).
    chunk = 256 if tn % 256 == 0 else tn
    for c in range(tn // chunk):                           # static unrolled loop
        idx_c = idx_ref[:, pl.ds(c * chunk, chunk)]        # (1, chunk)
        mask = (idx_c == vids).astype(pf_ref.dtype)        # (tv, chunk) one-hot
        o_ref[...] += jnp.dot(mask, pf_ref[pl.ds(c * chunk, chunk), :],
                              preferred_element_type=jnp.float32)   # MXU

    @pl.when(n_step == pl.num_programs(1) - 1)
    def _():
        cnt = cnt_ref[...]
        denom = jnp.maximum(cnt, 1).astype(jnp.float32)
        o_ref[...] = jnp.where(cnt > 0, o_ref[...] / denom, 0.0)


def scatter_to(point_feats, scatter_index, scatter_count_p, num_voxels_p,
               reduce_type, tv, tn):
    """point_feats: [Np, C]; scatter_index: [Np] int32 (-1 = padded/dead row);
    scatter_count_p: [Vp] int32; output: [Vp, C] f32."""
    Np, C = point_feats.shape
    Vp = num_voxels_p
    assert Vp % tv == 0 and Np % tn == 0
    grid = (Vp // tv, Np // tn)
    cnt2d = scatter_count_p.reshape(Vp, 1).astype(jnp.int32)
    isz = point_feats.dtype.itemsize
    vmem = _vmem_limit(tn * C * isz, tv * C * 4, tv * 4, tn * 4)
    cparams = pltpu.CompilerParams(
        dimension_semantics=("parallel", "arbitrary"), vmem_limit_bytes=vmem)

    # TODO(synk): algorithmic upgrade for production sizes — argsort points by
    # voxel id in the encoder and scalar-prefetch per-voxel-tile point ranges so
    # (v, n) tile pairs with no overlap are skipped (O(N+V) tiles, not O(N*V)).

    if reduce_type == 0:   # max
        # TODO(synk): at production Np the 1-D scalar-prefetch buffer pads to
        # next_pow2(4*Np) bytes of SMEM; switch to a (1, tn) SMEM-blocked input
        # before scaling past ~1e5 points.
        return pl.pallas_call(
            _scatter_max_kernel,
            out_shape=jax.ShapeDtypeStruct((Vp, C), jnp.float32),
            grid_spec=pltpu.PrefetchScalarGridSpec(
                num_scalar_prefetch=1,                      # scatter_index -> SMEM
                grid=grid,
                in_specs=[
                    pl.BlockSpec((tv, 1), lambda v, n, idx: (v, 0)),
                    pl.BlockSpec((tn, C), lambda v, n, idx: (n, 0)),
                ],
                out_specs=pl.BlockSpec((tv, C), lambda v, n, idx: (v, 0)),
            ),
            compiler_params=cparams,
        )(scatter_index.astype(jnp.int32), cnt2d, point_feats)
    else:                  # mean (one-hot matmul on MXU)
        idx2d = scatter_index.reshape(1, Np).astype(jnp.int32)
        return pl.pallas_call(
            _scatter_mean_kernel,
            out_shape=jax.ShapeDtypeStruct((Vp, C), jnp.float32),
            grid_spec=pltpu.PrefetchScalarGridSpec(
                num_scalar_prefetch=0,
                grid=grid,
                in_specs=[
                    pl.BlockSpec((1, tn), lambda v, n: (0, n)),
                    pl.BlockSpec((tv, 1), lambda v, n: (v, 0)),
                    pl.BlockSpec((tn, C), lambda v, n: (n, 0)),
                ],
                out_specs=pl.BlockSpec((tv, C), lambda v, n: (v, 0)),
            ),
            compiler_params=cparams,
        )(idx2d, cnt2d, point_feats)


# --------------------------------------------------------------------------
# cylinder_encoder (plain-JAX glue): cartesian -> cylindrical voxelization
# --------------------------------------------------------------------------
def cylinder_encoder(batch_point_feats, batch_indices, cylinder_config,
                     in_spatial_shape, max_num_act_out):
    # batch_point_feats: [N, 4] = (x, y, z, intensity); batch_indices: [N] int32
    x = batch_point_feats[:, 0]
    y = batch_point_feats[:, 1]
    z = batch_point_feats[:, 2]
    intensity = batch_point_feats[:, 3]

    rho = jnp.sqrt(x * x + y * y)
    phi = jnp.arctan2(y, x)

    rho_min, rho_max = cylinder_config[0], cylinder_config[1]
    phi_min, phi_max = cylinder_config[2], cylinder_config[3]
    z_min, z_max = cylinder_config[4], cylinder_config[5]
    n_rho, n_phi, n_z = in_spatial_shape  # static python ints

    drho = (rho_max - rho_min) / n_rho
    dphi = (phi_max - phi_min) / n_phi
    dz = (z_max - z_min) / n_z

    ir = jnp.clip(jnp.floor((rho - rho_min) / drho).astype(jnp.int32), 0, n_rho - 1)
    ip = jnp.clip(jnp.floor((phi - phi_min) / dphi).astype(jnp.int32), 0, n_phi - 1)
    iz = jnp.clip(jnp.floor((z - z_min) / dz).astype(jnp.int32), 0, n_z - 1)

    # per-point features: cyl coords, raw feats, offsets to voxel center -> [N, 9]
    c_rho = rho_min + (ir.astype(jnp.float32) + 0.5) * drho
    c_phi = phi_min + (ip.astype(jnp.float32) + 0.5) * dphi
    c_z = z_min + (iz.astype(jnp.float32) + 0.5) * dz
    pts_feats = jnp.stack(
        [rho, phi, z, intensity, x, y, rho - c_rho, phi - c_phi, z - c_z], axis=1
    ).astype(jnp.float32)

    vox_id = ((batch_indices.astype(jnp.int32) * n_z + iz) * n_phi + ip) * n_rho + ir

    # TODO(synk): if the true number of active voxels exceeds max_num_act_out,
    # jnp.unique(size=...) silently truncates -> add a host-side check.
    uniq, inv = jnp.unique(vox_id, return_inverse=True,
                           size=max_num_act_out, fill_value=-1)
    scatter_index = inv.reshape(-1).astype(jnp.int32)
    scatter_count = jnp.zeros((max_num_act_out,), jnp.int32).at[scatter_index].add(1)
    num_act_out = jnp.sum(uniq >= 0).astype(jnp.int32)

    ir_u = jnp.mod(uniq, n_rho)
    t = uniq // n_rho
    ip_u = jnp.mod(t, n_phi)
    t = t // n_phi
    iz_u = jnp.mod(t, n_z)
    ib_u = t // n_z
    out_coors = jnp.stack([ib_u, iz_u, ip_u, ir_u], axis=1).astype(jnp.int32)
    out_coors = jnp.where((uniq >= 0)[:, None], out_coors, -1)

    return pts_feats, scatter_index, scatter_count, out_coors, num_act_out


# --------------------------------------------------------------------------
# Parameter init (deterministic, BatchNorm folded into the weight + bias)
# --------------------------------------------------------------------------
def _make_layer(key, c_in, c_out, eps=1e-3):
    kw, kg, kb, km, kv = jax.random.split(key, 5)
    w = 0.1 * jax.random.normal(kw, (c_out, c_in), jnp.float32)     # torch Linear: [out, in]
    gamma = jax.random.uniform(kg, (c_out,), jnp.float32, 0.5, 1.5)
    beta = 0.05 * jax.random.normal(kb, (c_out,), jnp.float32)
    rmean = 0.05 * jax.random.normal(km, (c_out,), jnp.float32)
    rvar = jax.random.uniform(kv, (c_out,), jnp.float32, 0.5, 1.5)
    scale = gamma / jnp.sqrt(rvar + eps)
    bias = beta - rmean * scale
    w_folded_t = w.T * scale[None, :]          # fold BN scale into the weight
    return (w_folded_t, bias.reshape(1, c_out))


def init_params(key, c_in=9, pfn_dims=(32, 64), post_dim=32):
    keys = jax.random.split(key, len(pfn_dims) + 1)
    pfn = []
    in_dim = c_in
    for i, out_dim in enumerate(pfn_dims):
        pfn.append(_make_layer(keys[i], in_dim, out_dim))
        in_dim = 2 * out_dim  # concat([point_feats, gathered voxel feats])
    post = _make_layer(keys[-1], pfn_dims[-1], post_dim)
    return {"pfn": pfn, "post": post}


# --------------------------------------------------------------------------
# PointFeatureNet.forward
# --------------------------------------------------------------------------
def point_feature_net_forward(params, batch_point_feats, batch_indices,
                              cylinder_config, in_spatial_shape,
                              max_num_act_out, reduce_type=0, use_bf16=False):
    pts_feats, scatter_index, scatter_count, out_coors, num_act_out = cylinder_encoder(
        batch_point_feats, batch_indices, cylinder_config, in_spatial_shape,
        max_num_act_out)

    N = pts_feats.shape[0]
    V = max_num_act_out
    cdt = jnp.bfloat16 if use_bf16 else jnp.float32

    # ---- pad rows ONCE so every kernel sees aligned tiles ----
    # scatter point-chunk: 1024 rows/step amortizes the ~0.35us/step overhead;
    # small inputs collapse to a single full tile.
    tn = 1024 if N >= 1024 else _round_up(N, 8)
    np_ = _round_up(N, tn)
    # voxel tile: 512 for mean (output-resident VMEM block fed by the MXU);
    # 128 for max (accumulator carried in vregs through the per-point loop).
    tv = 512 if reduce_type != 0 else 128
    if V < tv:
        tv = _round_up(V, 8)
    vp = _round_up(V, tv)

    pts_feats_p = jnp.pad(pts_feats, ((0, np_ - N), (0, 0)))
    # padded point rows get scatter_index = -1 -> never match any voxel tile
    sidx_p = jnp.pad(scatter_index, (0, np_ - N), constant_values=-1)
    scnt_p = jnp.pad(scatter_count, (0, vp - V))

    layers = params["pfn"]
    point_feats = None
    voxel_feats = None
    for i, (w, b) in enumerate(layers):
        if i == 0:
            point_feats = linear_relu(pts_feats_p, w, b,
                                      compute_dtype=cdt, out_dtype=cdt)       # Pallas
        else:
            # fused gather-back + concat + linear:
            #   concat([pf, voxel[sidx]]) @ [W_top; W_bot] == pf@W_top + voxel[sidx]@W_bot
            c_prev = point_feats.shape[1]
            w_top, w_bot = w[:c_prev], w[c_prev:]
            # TODO(synk): when Vp*C fits the VMEM budget, pass voxel_feats as a
            # whole-array block into dual_linear_relu and gather rows in-kernel
            # to avoid this [Np, C] HBM round trip.
            gathered = jnp.take(voxel_feats.astype(cdt),
                                jnp.maximum(sidx_p, 0), axis=0)               # glue
            point_feats = dual_linear_relu(point_feats, gathered,
                                           w_top, w_bot, b,
                                           compute_dtype=cdt, out_dtype=cdt)  # Pallas
        voxel_feats = scatter_to(point_feats, sidx_p, scnt_p, vp,
                                 reduce_type, tv, tn)                         # Pallas

    w, b = params["post"]
    voxel_feats = linear_relu(voxel_feats, w, b,
                              compute_dtype=cdt, out_dtype=jnp.float32)       # Pallas
    return voxel_feats[:V], out_coors, num_act_out


# --------------------------------------------------------------------------
# Pure-JAX reference (for a correctness cross-check)
# --------------------------------------------------------------------------
def _ref_forward(params, batch_point_feats, batch_indices, cylinder_config,
                 in_spatial_shape, max_num_act_out, reduce_type=0):
    pts_feats, scatter_index, scatter_count, out_coors, num_act_out = cylinder_encoder(
        batch_point_feats, batch_indices, cylinder_config, in_spatial_shape,
        max_num_act_out)

    def lbr(x, w, b):
        return jnp.maximum(x @ w + b, 0.0)

    def scat(pf):
        if reduce_type == 0:
            vm = jax.ops.segment_max(pf, scatter_index, num_segments=max_num_act_out)
        else:
            vm = jax.ops.segment_sum(pf, scatter_index, num_segments=max_num_act_out)
            vm = vm / jnp.maximum(scatter_count, 1)[:, None].astype(jnp.float32)
        return jnp.where((scatter_count > 0)[:, None], vm, 0.0)

    n_layers = len(params["pfn"])
    voxel_feats = None
    for i, (w, b) in enumerate(params["pfn"]):
        point_feats = lbr(pts_feats, w, b)
        voxel_feats = scat(point_feats)
        if i != n_layers - 1:
            pts_feats = jnp.concatenate(
                [point_feats, jnp.take(voxel_feats, scatter_index, axis=0)], axis=1)
    w, b = params["post"]
    return lbr(voxel_feats, w, b), out_coors, num_act_out


# --------------------------------------------------------------------------
if __name__ == "__main__":
    key = jax.random.PRNGKey(0)
    k_xy, k_z, k_i, k_p = jax.random.split(key, 4)

    N = 256                       # total points (2 batches of 128)
    B = 2
    max_num_act_out = 256         # small synthetic voxel budget
    in_spatial_shape = (8, 8, 4)  # (n_rho, n_phi, n_z) bins

    xy = jax.random.uniform(k_xy, (N, 2), jnp.float32, -40.0, 40.0)
    zc = jax.random.uniform(k_z, (N, 1), jnp.float32, -3.5, 1.5)
    it = jax.random.uniform(k_i, (N, 1), jnp.float32, 0.0, 1.0)
    batch_point_feats = jnp.concatenate([xy, zc, it], axis=1)          # [N, 4]
    batch_indices = jnp.concatenate(
        [jnp.zeros((N // B,), jnp.int32), jnp.ones((N - N // B,), jnp.int32)])
    cylinder_config = jnp.array(
        [0.0, 60.0, -math.pi, math.pi, -4.0, 2.0], jnp.float32)

    params = init_params(k_p, c_in=9, pfn_dims=(32, 64), post_dim=32)

    for reduce_type in (0, 1):    # 0 = max (module default), 1 = mean
        ref_vf, ref_coors, ref_n = _ref_forward(
            params, batch_point_feats, batch_indices, cylinder_config,
            in_spatial_shape, max_num_act_out, reduce_type)

        # f32 path: tight match against the pure-JAX reference
        voxel_feats, out_coors, num_act_out = point_feature_net_forward(
            params, batch_point_feats, batch_indices, cylinder_config,
            in_spatial_shape, max_num_act_out, reduce_type, use_bf16=False)
        jax.block_until_ready((voxel_feats, out_coors, num_act_out))
        assert voxel_feats.shape == (max_num_act_out, 32)
        assert out_coors.shape == (max_num_act_out, 4)
        assert jnp.allclose(voxel_feats, ref_vf, rtol=1e-3, atol=1e-3), reduce_type
        assert jnp.array_equal(out_coors, ref_coors)
        assert int(num_act_out) == int(ref_n)

        # bf16 matmul-operand path (halves HBM traffic on [N, C] streams;
        # f32 accumulation + epilogue): loose tolerance vs the f32 reference.
        vf16, _, _ = point_feature_net_forward(
            params, batch_point_feats, batch_indices, cylinder_config,
            in_spatial_shape, max_num_act_out, reduce_type, use_bf16=True)
        jax.block_until_ready(vf16)
        assert jnp.allclose(vf16, ref_vf, rtol=1e-1, atol=1.0), reduce_type

    print("KERNEL_OK")
</pallas_src>

<mosaic_0001>
module attributes {stable_mosaic.version = 11 : i64} {
  func.func @_linear_relu_kernel(%arg0: i32, %arg1: memref<256x9xf32, #tpu.memory_space<vmem>>, %arg2: memref<9x32xf32, #tpu.memory_space<vmem>>, %arg3: memref<1x32xf32, #tpu.memory_space<vmem>>, %arg4: memref<256x32xf32, #tpu.memory_space<vmem>>) attributes {dimension_semantics = [#tpu.dimension_semantics<parallel>], iteration_bounds = array<i64: 1>, scalar_prefetch = 0 : i64, scratch_operands = 0 : i64, tpu.core_type = #tpu.core_type<tc>, window_params = [{transform_indices = @transform_0, window_bounds = array<i64: 256, 9>}, {pipeline_mode = #tpu.pipeline_mode<synchronous>, transform_indices = @transform_1, window_bounds = array<i64: 9, 32>}, {pipeline_mode = #tpu.pipeline_mode<synchronous>, transform_indices = @transform_2, window_bounds = array<i64: 1, 32>}, {transform_indices = @transform_3, window_bounds = array<i64: 256, 32>}]} {
    %c0 = arith.constant 0 : index
    %c0_0 = arith.constant 0 : index
    %0 = vector.load %arg1[%c0, %c0_0] : memref<256x9xf32, #tpu.memory_space<vmem>>, vector<256x9xf32>
    %c0_1 = arith.constant 0 : index
    %c0_2 = arith.constant 0 : index
    %1 = vector.load %arg2[%c0_1, %c0_2] : memref<9x32xf32, #tpu.memory_space<vmem>>, vector<9x32xf32>
    %cst = arith.constant dense<0.000000e+00> : vector<256x32xf32>
    %2 = tpu.matmul %0, %1, %cst {dimension_numbers = #tpu.dot_dimension_numbers<[1], [0], [0], [1], [0, 0, 1, 1], [], []>} : vector<256x9xf32>, vector<9x32xf32>, vector<256x32xf32> -> vector<256x32xf32>
    %c0_3 = arith.constant 0 : index
    %c0_4 = arith.constant 0 : index
    %3 = vector.load %arg3[%c0_3, %c0_4] : memref<1x32xf32, #tpu.memory_space<vmem>>, vector<1x32xf32>
    %4 = vector.broadcast %3 : vector<1x32xf32> to vector<256x32xf32>
    %5 = arith.addf %2, %4 : vector<256x32xf32>
    %cst_5 = arith.constant 0.000000e+00 : f32
    %6 = vector.broadcast %cst_5 : f32 to vector<256x32xf32>
    %7 = arith.maximumf %5, %6 : vector<256x32xf32>
    %c0_6 = arith.constant 0 : index
    %c0_7 = arith.constant 0 : index
    %8 = vector.load %arg4[%c0_6, %c0_7] : memref<256x32xf32, #tpu.memory_space<vmem>>, vector<256x32xf32>
    tpu.vector_store %arg4[%c0_6, %c0_7], %7 {strides = array<i32>} : memref<256x32xf32, #tpu.memory_space<vmem>>, vector<256x32xf32>,
    return
  }
  func.func @transform_0(%arg0: i32) -> (i32, i32) {
    %c0_i32 = arith.constant 0 : i32
    %c0_i32_0 = arith.constant 0 : i32
    return %arg0, %c0_i32 : i32, i32
  }
  func.func @transform_1(%arg0: i32) -> (i32, i32) {
    %c0_i32 = arith.constant 0 : i32
    %c0_i32_0 = arith.constant 0 : i32
    %c0_i32_1 = arith.constant 0 : i32
    return %c0_i32, %c0_i32_0 : i32, i32
  }
  func.func @transform_2(%arg0: i32) -> (i32, i32) {
    %c0_i32 = arith.constant 0 : i32
    %c0_i32_0 = arith.constant 0 : i32
    %c0_i32_1 = arith.constant 0 : i32
    return %c0_i32, %c0_i32_0 : i32, i32
  }
  func.func @transform_3(%arg0: i32) -> (i32, i32) {
    %c0_i32 = arith.constant 0 : i32
    %c0_i32_0 = arith.constant 0 : i32
    return %arg0, %c0_i32 : i32, i32
  }
}

</mosaic_0001>

<bundles_post_ra>
// kernel: tpu_custom_call.1
= control target key start
LH: loop header
LB: loop body
LE: loop exit
PB: predicated region body
PF: predicated region fallthrough
CT: control target
= control target key end

     0   :  { %vm152_vm0 = vcmask 1040384   ;;  %vm55_vm1 = vcmask 72704   ;;  %vm579_vm2 = vmmov 1   ;;  %vm413_vm4 = vcmask 261120   ;;  %s899_s1 = inlined_call_operand.vmem [shape: f32[9,32], index: 1, kind: input, shape index: {}]   ;;  %s900_s0 = inlined_call_operand.vmem [shape: f32[256,9], index: 0, kind: input, shape index: {}]   ;;  %s901_s2 = inlined_call_operand.vmem [shape: f32[1,32], index: 2, kind: input, shape index: {}]   ;;  %s902_s3 = inlined_call_operand.vmem [shape: f32[256,32], index: 3, kind: output, shape index: {}]  }
   0x1   :  { %v46_v0 = vld [vmem:[%s899_s1] sm:$0xff]  ;;  %v47_v1 = vld [vmem:[%s899_s1 + $0x8] sm:$0x1]  ;;  %vm571_vm3 = vmpackc.low %vm152_vm0, %vm579_vm2 }
   0x2   :  { %v570_v2 = vpack.c.bf16 %v47_v1, %v46_v0  ;;  %v14_v3 = vld [vmem:[%s900_s0] sm:$0xff]  ;;  %v15_v5 = vld [vmem:[%s900_s0 + $0x8] sm:$0xff]  ;;  %v16_v7 = vld [vmem:[%s900_s0 + $0x10] sm:$0xff] }
   0x3   :  { %v30_v4 = vld [vmem:[%s900_s0 + $0x80] sm:$0xff]  ;;  %522 = vmatprep.mubr.msk.f32.mxu0 %vm55_vm1, %v14_v3  ;;  %v31_v6 = vld [vmem:[%s900_s0 + $0x88] sm:$0xff]  ;;  %v32_v8 = vld [vmem:[%s900_s0 + $0x90] sm:$0xff] }
   0x4   :  { %546 = vmatprep.mubr.msk.f32.mxu1 %vm55_vm1, %v30_v4  ;;  %572 = vmatprep.subr.msk.bf16.mxu0 %vm571_vm3, %v570_v2  ;;  %v17_v9 = vld [vmem:[%s900_s0 + $0x18] sm:$0xff]  ;;  %v18_v11 = vld [vmem:[%s900_s0 + $0x20] sm:$0xff]  ;;  %v19_v13 = vld [vmem:[%s900_s0 + $0x28] sm:$0xff] }
   0x5   :  { %576 = vmatprep.subr.msk.bf16.mxu1 %vm571_vm3, %v570_v2  ;;  %575 = vmatpush3.bf16.msk.msra.mxu0 %vm571_vm3, %v570_v2  ;;  %v33_v10 = vld [vmem:[%s900_s0 + $0x98] sm:$0xff]  ;;  %v34_v12 = vld [vmem:[%s900_s0 + $0xa0] sm:$0xff]  ;;  %v35_v14 = vld [vmem:[%s900_s0 + $0xa8] sm:$0xff] }
   0x6   :  { %577 = vmatpush3.bf16.msk.msra.mxu1 %vm571_vm3, %v570_v2  ;;  %v20_v15 = vld [vmem:[%s900_s0 + $0x30] sm:$0xff]  ;;  %v21_v17 = vld [vmem:[%s900_s0 + $0x38] sm:$0xff]  ;;  %v22_v19 = vld [vmem:[%s900_s0 + $0x40] sm:$0xff] }
   0x7   :  { %v36_v16 = vld [vmem:[%s900_s0 + $0xb0] sm:$0xff]  ;;  %v37_v18 = vld [vmem:[%s900_s0 + $0xb8] sm:$0xff]  ;;  %v38_v20 = vld [vmem:[%s900_s0 + $0xc0] sm:$0xff] }
   0x8   :  { %523 = vmatmul.mubr.msk.f32.vlgmr.msra.gmra.mrb[0].mxu0 %vm55_vm1, %v15_v5  ;;  %v23_v21 = vld [vmem:[%s900_s0 + $0x48] sm:$0xff]  ;;  %v24_v23 = vld [vmem:[%s900_s0 + $0x50] sm:$0xff]  ;;  %v25_v25 = vld [vmem:[%s900_s0 + $0x58] sm:$0xff] }
   0x9   :  { %547 = vmatmul.mubr.msk.f32.vlgmr.msra.gmra.mrb[0].mxu1 %vm55_vm1, %v31_v6  ;;  %525 = vmatprep.mubr.msk.f32.mxu0 %vm55_vm1, %v16_v7  ;;  %v39_v22 = vld [vmem:[%s900_s0 + $0xc8] sm:$0xff]  ;;  %v40_v24 = vld [vmem:[%s900_s0 + $0xd0] sm:$0xff]  ;;  %v41_v26 = vld [vmem:[%s900_s0 + $0xd8] sm:$0xff] }
   0xa   :  { %549 = vmatprep.mubr.msk.f32.mxu1 %vm55_vm1, %v32_v8  ;;  %v26_v27 = vld [vmem:[%s900_s0 + $0x60] sm:$0xff]  ;;  %v27_v29 = vld [vmem:[%s900_s0 + $0x68] sm:$0xff]  ;;  %v28_v31 = vld [vmem:[%s900_s0 + $0x70] sm:$0xff] }
   0xb   :  { %v42_v28 = vld [vmem:[%s900_s0 + $0xe0] sm:$0xff]  ;;  %v43_v30 = vld [vmem:[%s900_s0 + $0xe8] sm:$0xff]  ;;  %v44_v32 = vld [vmem:[%s900_s0 + $0xf0] sm:$0xff] }
   0xc   :  { %526 = vmatmul.mubr.msk.f32.gmra.mrb[2].mxu0 %vm55_vm1, %v17_v9  ;;  %v29_v33 = vld [vmem:[%s900_s0 + $0x78] sm:$0xff]  ;;  %v737_v35 = vld [vmem:[%s901_s2] ss:$0 sm:$0xff] }
   0xd   :  { %550 = vmatmul.mubr.msk.f32.gmra.mrb[2].mxu1 %vm55_vm1, %v33_v10  ;;  %528 = vmatprep.mubr.msk.f32.mxu0 %vm55_vm1, %v18_v11  ;;  %v45_v34 = vld [vmem:[%s900_s0 + $0xf8] sm:$0xff] }
   0xe   :  { %552 = vmatprep.mubr.msk.f32.mxu1 %vm55_vm1, %v34_v12 }
  0x10   :  { %529 = vmatmul.mubr.msk.f32.gmra.mrb[4].mxu0 %vm55_vm1, %v19_v13 }
  0x11   :  { %553 = vmatmul.mubr.msk.f32.gmra.mrb[4].mxu1 %vm55_vm1, %v35_v14  ;;  %531 = vmatprep.mubr.msk.f32.mxu0 %vm55_vm1, %v20_v15 }
  0x12   :  { %555 = vmatprep.mubr.msk.f32.mxu1 %vm55_vm1, %v36_v16 }
  0x14   :  { %532 = vmatmul.mubr.msk.f32.gmra.mrb[6].mxu0 %vm55_vm1, %v21_v17 }
  0x15   :  { %556 = vmatmul.mubr.msk.f32.gmra.mrb[6].mxu1 %vm55_vm1, %v37_v18  ;;  %534 = vmatprep.mubr.msk.f32.mxu0 %vm55_vm1, %v22_v19 }
  0x16   :  { %558 = vmatprep.mubr.msk.f32.mxu1 %vm55_vm1, %v38_v20 }
  0x18   :  { %535 = vmatmul.mubr.msk.f32.gmra.mrb[8].mxu0 %vm55_vm1, %v23_v21 }
  0x19   :  { %559 = vmatmul.mubr.msk.f32.gmra.mrb[8].mxu1 %vm55_vm1, %v39_v22  ;;  %537 = vmatprep.mubr.msk.f32.mxu0 %vm55_vm1, %v24_v23 }
  0x1a   :  { %561 = vmatprep.mubr.msk.f32.mxu1 %vm55_vm1, %v40_v24 }
  0x1c   :  { %538 = vmatmul.mubr.msk.f32.gmra.mrb[10].mxu0 %vm55_vm1, %v25_v25 }
  0x1d   :  { %562 = vmatmul.mubr.msk.f32.gmra.mrb[10].mxu1 %vm55_vm1, %v41_v26  ;;  %540 = vmatprep.mubr.msk.f32.mxu0 %vm55_vm1, %v26_v27 }
  0x1e   :  { %564 = vmatprep.mubr.msk.f32.mxu1 %vm55_vm1, %v42_v28 }
  0x20   :  { %541 = vmatmul.mubr.msk.f32.gmra.mrb[12].mxu0 %vm55_vm1, %v27_v29 }
  0x21   :  { %565 = vmatmul.mubr.msk.f32.gmra.mrb[12].mxu1 %vm55_vm1, %v43_v30  ;;  %543 = vmatprep.mubr.msk.f32.mxu0 %vm55_vm1, %v28_v31 }
  0x22   :  { %567 = vmatprep.mubr.msk.f32.mxu1 %vm55_vm1, %v44_v32 }
  0x24   :  { %544 = vmatmul.mubr.msk.f32.gmra.mrb[14].mxu0 %vm55_vm1, %v29_v33 }
  0x25   :  { %568 = vmatmul.mubr.msk.f32.gmra.mrb[14].mxu1 %vm55_vm1, %v45_v34 }
  0xdb   :  { %v524_v36 = vpop.f32.mrb[0].mxu0 }
  0xdc   :  { %v548_v37 = vpop.f32.mrb[0].mxu1  ;;  %v228_v38 = vadd.f32 %v524_v36, %v737_v35  ;;  %v222_v40 = vpop.f32.mrb[1].mxu0 }
  0xdd   :  { %v308_v39 = vadd.f32 %v548_v37, %v737_v35  ;;  %v302_v41 = vpop.f32.mrb[1].mxu1  ;;  %v223_v42 = vadd.f32 %v737_v35, %v222_v40 }
  0xde   :  { %v303_v43 = vadd.f32 %v737_v35, %v302_v41  ;;  %v382_v44 = vmax.f32 %v228_v38, 0.0 }
  0xdf   :  { %v398_v45 = vmax.f32 %v308_v39, 0.0  ;;  %v381_v46 = vmax.f32 %v223_v42, 0.0  ;;  %v527_v48 = vpop.f32.mrb[2].mxu0 }
  0xe0   :  { %v397_v47 = vmax.f32 %v303_v43, 0.0  ;;  %v551_v49 = vpop.f32.mrb[2].mxu1  ;;  %415 = vst.msk [vmem:[%s902_s3 + $0x8] sm:$0xff] %vm413_vm4, %v382_v44  ;;  %v238_v50 = vadd.f32 %v527_v48, %v737_v35  ;;  %v232_v52 = vpop.f32.mrb[3].mxu0 }
  0xe1   :  { %431 = vst.msk [vmem:[%s902_s3 + $0x88] sm:$0xff] %vm413_vm4, %v398_v45  ;;  %v318_v51 = vadd.f32 %v551_v49, %v737_v35  ;;  %v312_v53 = vpop.f32.mrb[3].mxu1  ;;  %414 = vst.msk [vmem:[%s902_s3] sm:$0xff] %vm413_vm4, %v381_v46  ;;  %v233_v54 = vadd.f32 %v737_v35, %v232_v52 }
  0xe2   :  { %430 = vst.msk [vmem:[%s902_s3 + $0x80] sm:$0xff] %vm413_vm4, %v397_v47  ;;  %v313_v55 = vadd.f32 %v737_v35, %v312_v53  ;;  %v384_v56 = vmax.f32 %v238_v50, 0.0 }
  0xe3   :  { %v400_v57 = vmax.f32 %v318_v51, 0.0  ;;  %v383_v58 = vmax.f32 %v233_v54, 0.0  ;;  %v530_v60 = vpop.f32.mrb[4].mxu0 }
  0xe4   :  { %v399_v59 = vmax.f32 %v313_v55, 0.0  ;;  %v554_v61 = vpop.f32.mrb[4].mxu1  ;;  %417 = vst.msk [vmem:[%s902_s3 + $0x18] sm:$0xff] %vm413_vm4, %v384_v56  ;;  %v248_v62 = vadd.f32 %v530_v60, %v737_v35  ;;  %v242_v0 = vpop.f32.mrb[5].mxu0 }
  0xe5   :  { %433 = vst.msk [vmem:[%s902_s3 + $0x98] sm:$0xff] %vm413_vm4, %v400_v57  ;;  %v328_v63 = vadd.f32 %v554_v61, %v737_v35  ;;  %v322_v1 = vpop.f32.mrb[5].mxu1  ;;  %416 = vst.msk [vmem:[%s902_s3 + $0x10] sm:$0xff] %vm413_vm4, %v383_v58  ;;  %v243_v2 = vadd.f32 %v737_v35, %v242_v0 }
  0xe6   :  { %432 = vst.msk [vmem:[%s902_s3 + $0x90] sm:$0xff] %vm413_vm4, %v399_v59  ;;  %v323_v3 = vadd.f32 %v737_v35, %v322_v1  ;;  %v386_v4 = vmax.f32 %v248_v62, 0.0 }
  0xe7   :  { %v402_v5 = vmax.f32 %v328_v63, 0.0  ;;  %v385_v6 = vmax.f32 %v243_v2, 0.0  ;;  %v533_v8 = vpop.f32.mrb[6].mxu0 }
  0xe8   :  { %v401_v7 = vmax.f32 %v323_v3, 0.0  ;;  %v557_v9 = vpop.f32.mrb[6].mxu1  ;;  %419 = vst.msk [vmem:[%s902_s3 + $0x28] sm:$0xff] %vm413_vm4, %v386_v4  ;;  %v258_v10 = vadd.f32 %v533_v8, %v737_v35  ;;  %v252_v12 = vpop.f32.mrb[7].mxu0 }
  0xe9   :  { %435 = vst.msk [vmem:[%s902_s3 + $0xa8] sm:$0xff] %vm413_vm4, %v402_v5  ;;  %v338_v11 = vadd.f32 %v557_v9, %v737_v35  ;;  %v332_v13 = vpop.f32.mrb[7].mxu1  ;;  %418 = vst.msk [vmem:[%s902_s3 + $0x20] sm:$0xff] %vm413_vm4, %v385_v6  ;;  %v253_v14 = vadd.f32 %v737_v35, %v252_v12 }
  0xea   :  { %434 = vst.msk [vmem:[%s902_s3 + $0xa0] sm:$0xff] %vm413_vm4, %v401_v7  ;;  %v333_v15 = vadd.f32 %v737_v35, %v332_v13  ;;  %v388_v16 = vmax.f32 %v258_v10, 0.0 }
  0xeb   :  { %v404_v17 = vmax.f32 %v338_v11, 0.0  ;;  %v387_v18 = vmax.f32 %v253_v14, 0.0  ;;  %v536_v20 = vpop.f32.mrb[8].mxu0 }
  0xec   :  { %v403_v19 = vmax.f32 %v333_v15, 0.0  ;;  %v560_v21 = vpop.f32.mrb[8].mxu1  ;;  %421 = vst.msk [vmem:[%s902_s3 + $0x38] sm:$0xff] %vm413_vm4, %v388_v16  ;;  %v268_v22 = vadd.f32 %v536_v20, %v737_v35  ;;  %v262_v24 = vpop.f32.mrb[9].mxu0 }
  0xed   :  { %437 = vst.msk [vmem:[%s902_s3 + $0xb8] sm:$0xff] %vm413_vm4, %v404_v17  ;;  %v348_v23 = vadd.f32 %v560_v21, %v737_v35  ;;  %v342_v25 = vpop.f32.mrb[9].mxu1  ;;  %420 = vst.msk [vmem:[%s902_s3 + $0x30] sm:$0xff] %vm413_vm4, %v387_v18  ;;  %v263_v26 = vadd.f32 %v737_v35, %v262_v24 }
  0xee   :  { %436 = vst.msk [vmem:[%s902_s3 + $0xb0] sm:$0xff] %vm413_vm4, %v403_v19  ;;  %v343_v27 = vadd.f32 %v737_v35, %v342_v25  ;;  %v390_v28 = vmax.f32 %v268_v22, 0.0 }
  0xef   :  { %v406_v29 = vmax.f32 %v348_v23, 0.0  ;;  %v389_v30 = vmax.f32 %v263_v26, 0.0  ;;  %v539_v32 = vpop.f32.mrb[10].mxu0 }
  0xf0   :  { %v405_v31 = vmax.f32 %v343_v27, 0.0  ;;  %v563_v33 = vpop.f32.mrb[10].mxu1  ;;  %423 = vst.msk [vmem:[%s902_s3 + $0x48] sm:$0xff] %vm413_vm4, %v390_v28  ;;  %v278_v34 = vadd.f32 %v539_v32, %v737_v35  ;;  %v272_v37 = vpop.f32.mrb[11].mxu0 }
  0xf1   :  { %439 = vst.msk [vmem:[%s902_s3 + $0xc8] sm:$0xff] %vm413_vm4, %v406_v29  ;;  %v358_v36 = vadd.f32 %v563_v33, %v737_v35  ;;  %v352_v38 = vpop.f32.mrb[11].mxu1  ;;  %422 = vst.msk [vmem:[%s902_s3 + $0x40] sm:$0xff] %vm413_vm4, %v389_v30  ;;  %v273_v39 = vadd.f32 %v737_v35, %v272_v37 }
  0xf2   :  { %438 = vst.msk [vmem:[%s902_s3 + $0xc0] sm:$0xff] %vm413_vm4, %v405_v31  ;;  %v353_v40 = vadd.f32 %v737_v35, %v352_v38  ;;  %v392_v41 = vmax.f32 %v278_v34, 0.0 }
  0xf3   :  { %v408_v42 = vmax.f32 %v358_v36, 0.0  ;;  %v391_v43 = vmax.f32 %v273_v39, 0.0  ;;  %v542_v45 = vpop.f32.mrb[12].mxu0 }
  0xf4   :  { %v407_v44 = vmax.f32 %v353_v40, 0.0  ;;  %v566_v46 = vpop.f32.mrb[12].mxu1  ;;  %425 = vst.msk [vmem:[%s902_s3 + $0x58] sm:$0xff] %vm413_vm4, %v392_v41  ;;  %v288_v47 = vadd.f32 %v542_v45, %v737_v35  ;;  %v282_v49 = vpop.f32.mrb[13].mxu0 }
  0xf5   :  { %441 = vst.msk [vmem:[%s902_s3 + $0xd8] sm:$0xff] %vm413_vm4, %v408_v42  ;;  %v368_v48 = vadd.f32 %v566_v46, %v737_v35  ;;  %v362_v50 = vpop.f32.mrb[13].mxu1  ;;  %424 = vst.msk [vmem:[%s902_s3 + $0x50] sm:$0xff] %vm413_vm4, %v391_v43  ;;  %v283_v51 = vadd.f32 %v737_v35, %v282_v49 }
  0xf6   :  { %440 = vst.msk [vmem:[%s902_s3 + $0xd0] sm:$0xff] %vm413_vm4, %v407_v44  ;;  %v363_v52 = vadd.f32 %v737_v35, %v362_v50  ;;  %v394_v53 = vmax.f32 %v288_v47, 0.0 }
  0xf7   :  { %v410_v54 = vmax.f32 %v368_v48, 0.0  ;;  %v393_v55 = vmax.f32 %v283_v51, 0.0  ;;  %v545_v57 = vpop.f32.mrb[14].mxu0 }
  0xf8   :  { %v409_v56 = vmax.f32 %v363_v52, 0.0  ;;  %v569_v58 = vpop.f32.mrb[14].mxu1  ;;  %427 = vst.msk [vmem:[%s902_s3 + $0x68] sm:$0xff] %vm413_vm4, %v394_v53  ;;  %v298_v59 = vadd.f32 %v545_v57, %v737_v35  ;;  %v292_v61 = vpop.f32.mrb[15].mxu0 }
  0xf9   :  { %443 = vst.msk [vmem:[%s902_s3 + $0xe8] sm:$0xff] %vm413_vm4, %v410_v54  ;;  %v378_v60 = vadd.f32 %v569_v58, %v737_v35  ;;  %v372_v62 = vpop.f32.mrb[15].mxu1  ;;  %426 = vst.msk [vmem:[%s902_s3 + $0x60] sm:$0xff] %vm413_vm4, %v393_v55  ;;  %v293_v63 = vadd.f32 %v737_v35, %v292_v61 }
  0xfa   :  { %442 = vst.msk [vmem:[%s902_s3 + $0xe0] sm:$0xff] %vm413_vm4, %v409_v56  ;;  %v373_v0 = vadd.f32 %v737_v35, %v372_v62  ;;  %v396_v1 = vmax.f32 %v298_v59, 0.0 }
  0xfb   :  { %v412_v2 = vmax.f32 %v378_v60, 0.0  ;;  %v395_v3 = vmax.f32 %v293_v63, 0.0 }
  0xfc   :  { %v411_v4 = vmax.f32 %v373_v0, 0.0  ;;  %429 = vst.msk [vmem:[%s902_s3 + $0x78] sm:$0xff] %vm413_vm4, %v396_v1 }
  0xfd   :  { %445 = vst.msk [vmem:[%s902_s3 + $0xf8] sm:$0xff] %vm413_vm4, %v412_v2  ;;  %428 = vst.msk [vmem:[%s902_s3 + $0x70] sm:$0xff] %vm413_vm4, %v395_v3 }
  0xfe   :  { %444 = vst.msk [vmem:[%s902_s3 + $0xf0] sm:$0xff] %vm413_vm4, %v411_v4 }

</bundles_post_ra>
